<compile_context>
chip_gen: v7x
topology: tpu7x:2x2x1
jax: 0.10.0
libtpu: 0.0.40
codegen_flags: <defaults>
</compile_context>

<pallas_src>
import functools

import jax
import jax.numpy as jnp
from jax.experimental import pallas as pl
from jax.experimental.pallas import tpu as pltpu


def _round_up(x, m):
    return ((x + m - 1) // m) * m


def _pick_tile_rows(n, m, itemsizes, target_block_bytes=8 << 20):
    """Rows per grid step, sized from M and the input dtypes."""
    # Sublane-packing multiple: 8 for f32, 16 for bf16, 32 for int8.
    mult = max([8] + [32 // max(int(it), 1) for it in itemsizes])
    bytes_per_row = max(sum(int(it) * m for it in itemsizes), 1)
    tn = max(mult, (target_block_bytes // bytes_per_row) // mult * mult)
    # Keep >= 2 grid steps when possible so the "parallel" axis can shard
    # across both TensorCores on v7x (and pipelining has something to overlap).
    if n > mult:
        tn = min(tn, _round_up(pl.cdiv(n, 2), mult))
    # Never make the block (much) taller than the array itself.
    tn = min(tn, _round_up(n, mult))
    return tn


def _weighted_supcon_kernel(score_ref, mask_ref, out_ref, *, inv_temp, n_rows):
    i = pl.program_id(0)
    tn = score_ref.shape[0]

    # Scale with a multiply (VPU) instead of an EUP divide; exp already
    # saturates the single EUP slot.
    s = score_ref[...].astype(jnp.float32) * inv_temp               # (tn, M)
    m = mask_ref[...].astype(jnp.float32)                           # (tn, M)

    row_max = jnp.max(s, axis=1, keepdims=True)                     # (tn, 1)
    sum_exp = jnp.sum(jnp.exp(s - row_max), axis=1, keepdims=True)  # (tn, 1)
    num_pos = jnp.sum(m, axis=1, keepdims=True)                     # (tn, 1)
    sm = jnp.sum(s * m, axis=1, keepdims=True)                      # (tn, 1)

    # -sum(log_softmax * mask)/num_pos = log(sum_exp) + row_max - sm/num_pos
    # NOTE: division by num_pos is intentionally unguarded for real rows to
    # match the PyTorch module (caller must supply >= 1 positive per row).
    loss = jnp.log(sum_exp) + row_max - sm / num_pos                # (tn, 1)

    # Ragged tail: rows past N were read out-of-bounds (garbage, possibly
    # producing NaN/Inf above); zero them on the *final* value so nothing
    # non-finite can leak into the output. (OOB output rows are dropped by
    # Pallas anyway; this is belt-and-suspenders.)
    row = jax.lax.broadcasted_iota(jnp.int32, (tn, 1), 0) + i * tn
    out_ref[...] = jnp.where(row < n_rows, loss, 0.0)


def weighted_supcon(score, mask, weight, temperature=0.1,
                    target_block_bytes=8 << 20):
    """score: (N, M), mask: (N, M), weight: (N,). Returns scalar f32 loss."""
    N, M = score.shape
    tn = _pick_tile_rows(
        N, M, (score.dtype.itemsize, mask.dtype.itemsize), target_block_bytes)
    num_tiles = pl.cdiv(N, tn)
    inv_temp = float(1.0 / temperature)

    per_row = pl.pallas_call(
        functools.partial(_weighted_supcon_kernel,
                          inv_temp=inv_temp, n_rows=N),
        out_shape=jax.ShapeDtypeStruct((N, 1), jnp.float32),
        grid_spec=pltpu.PrefetchScalarGridSpec(
            num_scalar_prefetch=0,
            grid=(num_tiles,),
            in_specs=[
                pl.BlockSpec((tn, M), lambda i: (i, 0)),   # score
                pl.BlockSpec((tn, M), lambda i: (i, 0)),   # mask
            ],
            out_specs=pl.BlockSpec((tn, 1), lambda i: (i, 0)),
        ),
        compiler_params=pltpu.CompilerParams(
            dimension_semantics=("parallel",),
            # 48 MiB: fits v7x's 64 MiB physical VMEM, lifts v5e's 16 MiB
            # default scoped limit so the multi-MiB tiles above are legal.
            vmem_limit_bytes=48 << 20,
        ),
    )(score, mask)

    # Weighting + batch sum: tiny (N,) dot in the wrapper, no per-tile DMA of
    # weight needed inside the kernel.
    return jnp.dot(per_row[:, 0], weight.astype(jnp.float32))


def weighted_supcon_ref(score, mask, weight, temperature=0.1):
    s = score.astype(jnp.float32) / temperature
    logp = jax.nn.log_softmax(s, axis=1)
    num_pos = mask.astype(jnp.float32).sum(1)
    loss = -(logp * mask.astype(jnp.float32)).sum(1) / num_pos
    return (loss * weight.astype(jnp.float32)).sum()


if __name__ == "__main__":
    key = jax.random.PRNGKey(0)
    k1, k2, k3 = jax.random.split(key, 3)

    # Small but multi-tile with a ragged tail: N=20 rows, M=256 columns.
    # (tn resolves to 16 here -> grid of 2, last block ragged.)
    N, M = 20, 256
    temperature = 0.1

    score = jax.random.normal(k1, (N, M), dtype=jnp.float32)
    # Binary mask; force at least one positive per row so num_pos > 0.
    mask = (jax.random.uniform(k2, (N, M)) < 0.25).astype(jnp.float32)
    mask = mask.at[:, 0].set(1.0)
    weight = jax.random.uniform(k3, (N,), dtype=jnp.float32)

    out = weighted_supcon(score, mask, weight, temperature)
    out = jax.block_until_ready(out)

    ref = weighted_supcon_ref(score, mask, weight, temperature)
    assert jnp.allclose(out, ref, rtol=1e-4, atol=1e-4), (out, ref)

    print("KERNEL_OK")
</pallas_src>

<mosaic_0001>
module attributes {stable_mosaic.version = 11 : i64} {
  func.func @_weighted_supcon_kernel(%arg0: i32, %arg1: memref<16x256xf32, #tpu.memory_space<vmem>>, %arg2: memref<16x256xf32, #tpu.memory_space<vmem>>, %arg3: memref<16x1xf32, #tpu.memory_space<vmem>>) attributes {dimension_semantics = [#tpu.dimension_semantics<parallel>], iteration_bounds = array<i64: 2>, scalar_prefetch = 0 : i64, scratch_operands = 0 : i64, tpu.core_type = #tpu.core_type<tc>, window_params = [{transform_indices = @transform_0, window_bounds = array<i64: 16, 256>}, {transform_indices = @transform_1, window_bounds = array<i64: 16, 256>}, {transform_indices = @transform_2, window_bounds = array<i64: 16, 1>}]} {
    %c0 = arith.constant 0 : index
    %c0_0 = arith.constant 0 : index
    %0 = vector.load %arg1[%c0, %c0_0] : memref<16x256xf32, #tpu.memory_space<vmem>>, vector<16x256xf32>
    %cst = arith.constant 1.000000e+01 : f32
    %1 = vector.broadcast %cst : f32 to vector<16x256xf32>
    %2 = arith.mulf %0, %1 : vector<16x256xf32>
    %c0_1 = arith.constant 0 : index
    %c0_2 = arith.constant 0 : index
    %3 = vector.load %arg2[%c0_1, %c0_2] : memref<16x256xf32, #tpu.memory_space<vmem>>, vector<16x256xf32>
    %cst_3 = arith.constant dense<0xFF800000> : vector<16xf32>
    %4 = vector.multi_reduction <maximumf>, %2, %cst_3 [1] : vector<16x256xf32> to vector<16xf32>
    %5 = vector.shape_cast %4 : vector<16xf32> to vector<16x1xf32>
    %6 = vector.broadcast %5 : vector<16x1xf32> to vector<16x256xf32>
    %7 = arith.subf %2, %6 : vector<16x256xf32>
    %8 = math.exp %7 : vector<16x256xf32>
    %cst_4 = arith.constant dense<0.000000e+00> : vector<16xf32>
    %9 = vector.multi_reduction <add>, %8, %cst_4 [1] : vector<16x256xf32> to vector<16xf32>
    %10 = vector.shape_cast %9 : vector<16xf32> to vector<16x1xf32>
    %cst_5 = arith.constant dense<0.000000e+00> : vector<16xf32>
    %11 = vector.multi_reduction <add>, %3, %cst_5 [1] : vector<16x256xf32> to vector<16xf32>
    %12 = vector.shape_cast %11 : vector<16xf32> to vector<16x1xf32>
    %13 = arith.mulf %2, %3 : vector<16x256xf32>
    %cst_6 = arith.constant dense<0.000000e+00> : vector<16xf32>
    %14 = vector.multi_reduction <add>, %13, %cst_6 [1] : vector<16x256xf32> to vector<16xf32>
    %15 = vector.shape_cast %14 : vector<16xf32> to vector<16x1xf32>
    %16 = math.log %10 : vector<16x1xf32>
    %17 = arith.addf %16, %5 : vector<16x1xf32>
    %18 = arith.divf %15, %12 : vector<16x1xf32>
    %19 = arith.subf %17, %18 : vector<16x1xf32>
    %20 = tpu.iota {dimensions = array<i32: 0>} : vector<16x1xi32>
    %c16_i32 = arith.constant 16 : i32
    %21 = arith.muli %arg0, %c16_i32 : i32
    %22 = vector.broadcast %21 : i32 to vector<16x1xi32>
    %23 = arith.addi %20, %22 : vector<16x1xi32>
    %c20_i32 = arith.constant 20 : i32
    %24 = vector.broadcast %c20_i32 : i32 to vector<16x1xi32>
    %25 = arith.cmpi slt, %23, %24 : vector<16x1xi32>
    %cst_7 = arith.constant 0.000000e+00 : f32
    %26 = vector.broadcast %cst_7 : f32 to vector<16x1xf32>
    %27 = arith.select %25, %19, %26 : vector<16x1xi1>, vector<16x1xf32>
    %c0_8 = arith.constant 0 : index
    %c0_9 = arith.constant 0 : index
    %28 = vector.load %arg3[%c0_8, %c0_9] : memref<16x1xf32, #tpu.memory_space<vmem>>, vector<16x1xf32>
    tpu.vector_store %arg3[%c0_8, %c0_9], %27 {strides = array<i32>} : memref<16x1xf32, #tpu.memory_space<vmem>>, vector<16x1xf32>,
    return
  }
  func.func @transform_0(%arg0: i32) -> (i32, i32) {
    %c0_i32 = arith.constant 0 : i32
    %c0_i32_0 = arith.constant 0 : i32
    return %arg0, %c0_i32 : i32, i32
  }
  func.func @transform_1(%arg0: i32) -> (i32, i32) {
    %c0_i32 = arith.constant 0 : i32
    %c0_i32_0 = arith.constant 0 : i32
    return %arg0, %c0_i32 : i32, i32
  }
  func.func @transform_2(%arg0: i32) -> (i32, i32) {
    %c0_i32 = arith.constant 0 : i32
    %c0_i32_0 = arith.constant 0 : i32
    return %arg0, %c0_i32 : i32, i32
  }
}

</mosaic_0001>

<bundles_post_ra>
// kernel: tpu_custom_call.1
= control target key start
LH: loop header
LB: loop body
LE: loop exit
PB: predicated region body
PF: predicated region fallthrough
CT: control target
= control target key end

     0   :  { %7 = vsyncpa [#allocation3], 0  ;;  %s1125_s0 = inlined_call_operand.hbm [shape: f32[20,256], index: 0, kind: input, shape index: {}]   ;;  %s1126_s1 = inlined_call_operand.hbm [shape: f32[20,256], index: 1, kind: input, shape index: {}]   ;;  %s1127_s2 = inlined_call_operand.vmem [shape: f32[20,1], index: 2, kind: output, shape index: {}]  }
   0x1   :  { %9 = vsyncpa [#allocation3 + $0x1], 0 }
   0x2   :  { %10 = vsyncpa [#allocation5], 0 }
   0x3   :  { %12 = vsyncpa [#allocation5 + $0x1], 0  ;;  %s913_s9 = smov 0   ;;  %s915_s10 = smov 0  }
   0x4   :  { %s917_s11 = smov 0   ;;  %s919_s12 = smov 0  }
   0x5 LB: > { %s932_s13 = sadd.s32 4294967295, %s858_s12   ;;  %s935_s14 = sadd.s32 1, %s858_s12   ;;  %s858_s12 = sphi %s919_s12, %s1135_s12   ;;  %s854_s11 = sphi %s917_s11, %s1134_s11   ;;  %s850_s10 = sphi %s915_s10, %s1133_s10   ;;  %s846_s9 = sphi %s913_s9, %s1132_s9  }
   0x6   : > { %s22_s15 = ssub.s32 %s858_s12, %s935_s14  ;;  %s25_s16 = sadd.s32 1, %s854_s11 }
   0x7   : > { %p23_p0 = scmp.eq.s32.totalorder %s22_s15, 0  ;;  %p32_p1 = scmp.ne.s32.totalorder %s854_s11, %s850_s10 }
   0x8   : > { %p33_p2 = scmp.eq.s32.totalorder %s858_s12, 0  ;;  %p38_p3 = scmp.ne.s32.totalorder %s850_s10, %s846_s9 }
   0x9   : > { %s945_s17 = scalar_select %p23_p0, %s854_s11, %s25_s16  }
   0xa   : > { %p947_p4 = por %p33_p2, %p32_p1  ;;  %p39_p5 = scmp.eq.s32.totalorder %s932_s13, 0 }
   0xb   : > { %p88_p6 = scmp.eq.s32.totalorder %s932_s13, 1  ;;  %p564_p9 = scmp.ge.s32.totalorder %s858_s12, 2 }
   0xc   : > { %p953_p7 = por %p39_p5, %p38_p3 }
   0xd   : > { %p957_p8 = por %p88_p6, %p32_p1  ;;  %110 = sbr.rel (%p564_p9) target bundleno = 90 (0x5a), region = 16 }
   0xf   : > { %s1130_s20 = scalar_select %p957_p8, 1, 0 }
  0x14   : > { %113 = sbr.rel (!%p947_p4) target bundleno = 55 (0x37), region = 20  ;;  %s114_s21 = sand.u32 (%p947_p4), 1, %s854_s11  }
  0x15   : > { %s566_s22 = sshll.u32 (%p947_p4), %s858_s12, 1  ;;  %s565_s23 = sshll.u32 (%p947_p4), %s114_s21, 5 }
  0x16   : > { %s120_s24 = ssub.s32 (%p947_p4), 3, %s566_s22  ;;  %s969_s27 = scalar_lea.sflag (%p947_p4), [#allocation3], %s114_s21 }
  0x17   : > { %p121_p10 = scmp.lt.s32.totalorder (%p947_p4), %s120_s24, 2  ;;  %s118_s28 = scalar_lea.vmem (%p947_p4), [#allocation2], %s565_s23 }
  0x1b   : > { %s1137_s24 = smov (!%p121_p10, %s120_s24), 2 }
  0x1c   : > { %s966_s25 = sshll.u32 %s1137_s24, 8 }
  0x1d   : > { %s126_s26 = ssub.s32 512, %s966_s25 }
  0x1e   : > { %127 = vsyncadd %s969_s27, %s126_s26  ;;  %p569_p11 = scmp.ne.s32.totalorder %s966_s25, 0  ;;  %s607_s29 = sshll.u32 %s858_s12, 9 }
  0x1f   : > { %s977_s4 = scalar_lea.hbm %s1125_s0, %s607_s29  ;;  %s133_s5 = sshll.u32 %s118_s28, 4  ;;  %s979_s5 = int_to_ptr.vmem [resolvable:$true] %s133_s5 }
  0x20   : > { %s732_s6 = scalar_lea.hbm %s977_s4, %s966_s25  ;;  %s736_s9 = scalar_lea.hbm %s1125_s0, 768 }
  0x21   : > { %p733_p12 = scmp.ne.s32.totalorder %s977_s4, %s732_s6  ;;  %p737_p1 = scmp.lt.u32.totalorder %s977_s4, %s1125_s0 }
  0x22   : > { %p738_p2 = scmp.lt.u32.totalorder %s736_s9, %s732_s6  ;;  %p740_p5 = scmp.lt.u32.totalorder %s732_s6, %s977_s4 }
  0x23   : > { %p734_p13 = pnand %p733_p12, %p569_p11 }
  0x24   : > { %p739_p3 = por %p738_p2, %p737_p1 }
  0x25   : > { %p735_p0 = pneg %p734_p13 }
  0x26   : > { %p741_p6 = por %p740_p5, %p739_p3 }
  0x28   : > { %p742_p9 = pnand %p741_p6, %p735_p0 }
  0x2a   : > { %745 = shalt.err (!%p742_p9)
}
  0x2b   : > { %s746_s21 = scalar_lea.vmem %s979_s5, %s966_s25  ;;  %s892_s22 = smov [#allocation2]  }
  0x2c   : > { %p747_p10 = scmp.ne.s32.totalorder %s979_s5, %s746_s21  ;;  %s750_s23 = sshll.u32 %s892_s22, 4  ;;  %s751_s23 = int_to_ptr.vmem [resolvable:$false] %s750_s23 }
  0x2d   : > { %s752_s24 = scalar_lea.vmem %s751_s23, 1024  ;;  %p753_p8 = scmp.lt.s32.totalorder %s979_s5, %s751_s23 }
  0x2e   : > { %p748_p12 = pnand %p747_p10, %p569_p11  ;;  %p754_p1 = scmp.lt.s32.totalorder %s752_s24, %s746_s21 }
  0x30   : > { %p749_p13 = pneg %p748_p12  ;;  %p755_p2 = por %p754_p1, %p753_p8 }
  0x32   : > { %p756_p3 = pnand %p755_p2, %p749_p13 }
  0x34   : > { %759 = shalt.err (!%p756_p3)
}
  0x35   : > { %s893_s26 = smov 256   ;;  %s894_s28 = smov 16  }
  0x36   : > { %139 = dma.hbm_to_vmem [thread:$0]  (%p569_p11), %s977_s4, %s966_s25, %s979_s5, %s969_s27, %s893_s26, %s893_s26, %s894_s28  }
  0x37 PF: > { %142 = sbr.rel (!%p947_p4) target bundleno = 90 (0x5a), region = 24  ;;  %s143_s29 = sand.u32 (%p947_p4), 1, %s854_s11  }
  0x38   : > { %s575_s30 = sshll.u32 (%p947_p4), %s858_s12, 1  ;;  %s574_s3 = sshll.u32 (%p947_p4), %s143_s29, 5 }
  0x39   : > { %s149_s6 = ssub.s32 (%p947_p4), 3, %s575_s30  ;;  %s1013_s9 = scalar_lea.sflag (%p947_p4), [#allocation5], %s143_s29 }
  0x3a   : > { %p150_p8 = scmp.lt.s32.totalorder (%p947_p4), %s149_s6, 2  ;;  %s147_s25 = scalar_lea.vmem (%p947_p4), [#allocation4], %s574_s3 }
  0x3e   : > { %s1139_s6 = smov (!%p150_p8, %s149_s6), 2 }
  0x3f   : > { %s1010_s7 = sshll.u32 %s1139_s6, 8 }
  0x40   : > { %s155_s8 = ssub.s32 512, %s1010_s7 }
  0x41   : > { %156 = vsyncadd %s1013_s9, %s155_s8  ;;  %p578_p4 = scmp.ne.s32.totalorder %s1010_s7, 0  ;;  %s610_s18 = sshll.u32 %s858_s12, 9 }
  0x42   : > { %s1021_s5 = scalar_lea.hbm %s1126_s1, %s610_s18  ;;  %s162_s15 = sshll.u32 %s147_s25, 4  ;;  %s1023_s15 = int_to_ptr.vmem [resolvable:$true] %s162_s15 }
  0x43   : > { %s760_s16 = scalar_lea.hbm %s1021_s5, %s1010_s7  ;;  %s764_s23 = scalar_lea.hbm %s1126_s1, 768 }
  0x44   : > { %p761_p11 = scmp.ne.s32.totalorder %s1021_s5, %s760_s16  ;;  %p765_p6 = scmp.lt.u32.totalorder %s1021_s5, %s1126_s1 }
  0x45   : > { %p766_p9 = scmp.lt.u32.totalorder %s764_s23, %s760_s16  ;;  %p768_p12 = scmp.lt.u32.totalorder %s760_s16, %s1021_s5 }
  0x46   : > { %p762_p0 = pnand %p761_p11, %p578_p4 }
  0x47   : > { %p767_p10 = por %p766_p9, %p765_p6 }
  0x48   : > { %p763_p5 = pneg %p762_p0 }
  0x49   : > { %p769_p13 = por %p768_p12, %p767_p10 }
  0x4b   : > { %p770_p1 = pnand %p769_p13, %p763_p5 }
  0x4d   : > { %773 = shalt.err (!%p770_p1)
}
  0x4e   : > { %s774_s28 = scalar_lea.vmem %s1023_s15, %s1010_s7  ;;  %s895_s29 = smov [#allocation4]  }
  0x4f   : > { %p775_p2 = scmp.ne.s32.totalorder %s1023_s15, %s774_s28  ;;  %s778_s30 = sshll.u32 %s895_s29, 4  ;;  %s779_s30 = int_to_ptr.vmem [resolvable:$false] %s778_s30 }
  0x50   : > { %s780_s3 = scalar_lea.vmem %s779_s30, 1024  ;;  %p781_p11 = scmp.lt.s32.totalorder %s1023_s15, %s779_s30 }
  0x51   : > { %p776_p3 = pnand %p775_p2, %p578_p4  ;;  %p782_p0 = scmp.lt.s32.totalorder %s780_s3, %s774_s28 }
  0x53   : > { %p777_p8 = pneg %p776_p3  ;;  %p783_p6 = por %p782_p0, %p781_p11 }
  0x55   : > { %p784_p9 = pnand %p783_p6, %p777_p8 }
  0x57   : > { %787 = shalt.err (!%p784_p9)
}
  0x58   : > { %s896_s6 = smov 256   ;;  %s897_s8 = smov 16  }
  0x59   : > { %168 = dma.hbm_to_vmem [thread:$0]  (%p578_p4), %s1021_s5, %s1010_s7, %s1023_s15, %s1013_s9, %s896_s6, %s896_s6, %s897_s8  }
  0x5a PF: > { %p583_p5 = scmp.ge.s32.totalorder %s858_s12, 1  ;;  %p170_p10 = scmp.lt.s32.totalorder %s858_s12, 3 }
  0x5c   : > { %p171_p12 = pnand %p583_p5, %p170_p10 }
  0x5d   : > { %s1053_s25 = sand.u32 (!%p171_p12), 1, %s850_s10  }
  0x5e   : > { %174 = sbr.rel (%p171_p12) target bundleno = 485 (0x1e5), region = 28  ;;  %s584_s18 = sshll.u32 (!%p171_p12), %s1053_s25, 5 }
  0x5f   : > { %s177_s27 = scalar_lea.sflag (!%p171_p12), [#allocation3], %s1053_s25  ;;  %s180_s4 = scalar_lea.vmem (!%p171_p12), [#allocation2], %s584_s18 }
  0x65   : > { %837 = dma.done.wait (%p953_p7), %s177_s27, 512  }
  0x66   : > { %839 = vsyncadd (%p953_p7), %s177_s27, 4294966784  ;;  %s186_s7 = scalar_lea.sflag [#allocation5], %s1053_s25  ;;  %s1062_s12 = scalar_lea.vmem [#allocation4], %s584_s18 }
  0x67   : > { %841 = dma.done.wait (%p953_p7), %s186_s7, 512  }
  0x68   : > { %843 = vsyncadd (%p953_p7), %s186_s7, 4294966784  ;;  %v231_v0 = vld [vmem:[%s180_s4] sm:$0xff]  ;;  %v232_v1 = vld [vmem:[%s180_s4 + $0x8] sm:$0xff]  ;;  %v295_v40 = vlaneseq  ;;  %s587_s19 = sshll.u32 %s932_s13, 4  ;;  %s586_s9 = sshll.u32 %s1053_s25, 4  ;;  %vm306_vm1 = vcmask 7168  }
  0x69   : > { %v233_v2 = vld [vmem:[%s180_s4 + $0x10] sm:$0xff]  ;;  %v235_v3 = vmul.f32 10.0, %v231_v0  ;;  %v236_v4 = vmul.f32 10.0, %v232_v1  ;;  %v234_v5 = vld [vmem:[%s180_s4 + $0x18] sm:$0xff]  ;;  %v239_v10 = vld [vmem:[%s1062_s12] sm:$0xff]  ;;  %v299_v44 = vstv %s587_s19  ;;  %s1076_s5 = scalar_lea.vmem [#allocation6], %s586_s9  }
  0x6a   : > { %v237_v6 = vmul.f32 10.0, %v233_v2  ;;  %v238_v7 = vmul.f32 10.0, %v234_v5  ;;  %v240_v11 = vld [vmem:[%s1062_s12 + $0x8] sm:$0xff]  ;;  %v241_v31 = vld [vmem:[%s1062_s12 + $0x10] sm:$0xff]  ;;  %v242_v32 = vld [vmem:[%s1062_s12 + $0x18] sm:$0xff]  ;;  %v296_v42 = vshrl.u32 %v295_v40, 7 }
  0x6b   : > { %v243_v8 = vmax.f32 %v235_v3, %v236_v4  ;;  %v267_v12 = vadd.f32 %v240_v11, %v239_v10  ;;  %v273_v13 = vmul.f32 %v239_v10, %v235_v3  ;;  %v274_v14 = vmul.f32 %v240_v11, %v236_v4  ;;  %p1131_p7 = scmp.ne.s32.totalorder %s1130_s20, 0 }
  0x6c   : > { %v246_v9 = vmax.f32 %v237_v6, %v238_v7  ;;  %v270_v34 = vadd.f32 %v242_v32, %v241_v31  ;;  %v275_v35 = vmul.f32 %v241_v31, %v237_v6  ;;  %v276_v36 = vmul.f32 %v242_v32, %v238_v7  ;;  %s589_s15 = sshll.u32 (%p1131_p7), %s932_s13, 1  ;;  %s1088_s22 = scalar_lea.vmem (%p1131_p7), %s1127_s2, %s587_s19  }
  0x6d   : > { %244 = vmax.xlane.f32.xlu0 %v243_v8  ;;  %v277_v15 = vadd.f32 %v274_v14, %v273_v13  ;;  %v300_v48 = vadd.s32 %v299_v44, %v296_v42  ;;  %v297_v51 = vadd.s32 8, %v296_v42  ;;  %s317_s23 = ssub.s32 (%p1131_p7), 3, %s589_s15 }
  0x6e   : > { %v280_v37 = vadd.f32 %v276_v36, %v275_v35  ;;  %p318_p4 = scmp.lt.s32.totalorder (%p1131_p7), %s317_s23, 2 }
  0x6f   : > { %vm302_vm0 = vcmp.lt.s32.totalorder %v300_v48, 20  ;;  %v301_v56 = vadd.s32 %v299_v44, %v297_v51 }
  0x71   : > { %247 = vmax.xlane.f32.xlu0 %v246_v9  ;;  %vm303_vm2 = vcmp.lt.s32.totalorder %v301_v56, 20 }
  0x75   : > { %268 = vadd.xlane.f32.xlu0 %v267_v12 }
  0x79   : > { %278 = vadd.xlane.f32.xlu0 %v277_v15 }
  0xfa   : > { %v245_v16 = vpop.xlane.xlu0 %244 }
  0xfb   : > { %v249_v17 = vsub.f32 %v235_v3, %v245_v16  ;;  %v250_v18 = vsub.f32 %v236_v4, %v245_v16 }
  0xfd   : > { %v253_v19 = vmul.f32 1.442695, %v249_v17  ;;  %v255_v20 = vmul.f32 1.442695, %v250_v18 }
  0xfe   : > { %v248_v21 = vpop.xlane.xlu0 %247 }
  0xff   : > { %716 = vpow2.f32 %v253_v19  ;;  %v251_v22 = vsub.f32 %v237_v6, %v248_v21  ;;  %v252_v23 = vsub.f32 %v238_v7, %v248_v21 }
 0x100   : > { %718 = vpow2.f32 %v255_v20 }
 0x101   : > { %v257_v24 = vmul.f32 1.442695, %v251_v22  ;;  %v259_v25 = vmul.f32 1.442695, %v252_v23 }
 0x102   : > { %v269_v38 = vpop.xlane.xlu0 %268 }
 0x103   : > { %720 = vpow2.f32 %v257_v24 }
 0x104   : > { %722 = vpow2.f32 %v259_v25 }
 0x105   : > { %724 = vrcp.f32 %v269_v38 }
 0x106   : > { %v279_v46 = vpop.xlane.xlu0 %278 }
 0x109   : > { %v717_v26 = vpop.eup %716 }
 0x10a   : > { %v719_v27 = vpop.eup %718 }
 0x10b   : > { %v261_v28 = vadd.f32 %v719_v27, %v717_v26 }
 0x10d   : > { %v721_v29 = vpop.eup %720  ;;  %262 = vadd.xlane.f32.xlu1 %v261_v28 }
 0x10e   : > { %v723_v30 = vpop.eup %722 }
 0x10f   : > { %v264_v33 = vadd.f32 %v723_v30, %v721_v29  ;;  %v725_v45 = vpop.eup %724 }
 0x110   : > { %v290_v50 = vmul.f32 %v725_v45, %v279_v46 }
 0x111   : > { %265 = vadd.xlane.f32.xlu1 %v264_v33 }
 0x115   : > { %271 = vadd.xlane.f32.xlu1 %v270_v34 }
 0x119   : > { %281 = vadd.xlane.f32.xlu1 %v280_v37 }
 0x19a   : > { %v263_v39 = vpop.xlane.xlu1 %262 }
 0x19b   : > { %726 = vlog2.f32 %v263_v39 }
 0x19e   : > { %v266_v41 = vpop.xlane.xlu1 %265 }
 0x19f   : > { %728 = vlog2.f32 %v266_v41 }
 0x1a2   : > { %v272_v43 = vpop.xlane.xlu1 %271 }
 0x1a3   : > { %730 = vrcp.f32 %v272_v43 }
 0x1a5   : > { %v727_v47 = vpop.eup %726 }
 0x1a6   : > { %v284_v49 = vmul.f32 0.6931472, %v727_v47  ;;  %v282_v57 = vpop.xlane.xlu1 %281 }
 0x1a8   : > { %v287_v52 = vadd.f32 %v284_v49, %v245_v16 }
 0x1a9   : > { %v729_v53 = vpop.eup %728 }
 0x1aa   : > { %v286_v54 = vmul.f32 0.6931472, %v729_v53  ;;  %v293_v55 = vsub.f32 %v287_v52, %v290_v50 }
 0x1ac   : > { %v304_v58 = vsel %vm302_vm0, %v293_v55, 0.0  ;;  %v288_v60 = vadd.f32 %v286_v54, %v248_v21 }
 0x1ad   : > { %v731_v59 = vpop.eup %730  ;;  %307 = vst.msk [vmem:[%s1076_s5] sm:$0xff] %vm306_vm1, %v304_v58  ;;  %315 = sbr.rel (!%p1131_p7) target bundleno = 485 (0x1e5), region = 40 }
 0x1ae   : > { %v292_v61 = vmul.f32 %v731_v59, %v282_v57 }
 0x1b0   : > { %v294_v62 = vsub.f32 %v288_v60, %v292_v61 }
 0x1b2   : > { %v305_v63 = vsel %vm303_vm2, %v294_v62, 0.0 }
 0x1b3   : > { %308 = vst.msk [vmem:[%s1076_s5 + $0x8] sm:$0xff] %vm306_vm1, %v305_v63 }
 0x1b4   : > { %s1141_s23 = smov (!%p318_p4, %s317_s23), 2 }
 0x1b5   : > { %s590_s24 = sshll.u32 %s1141_s23, 7 }
 0x1b6   : > { %p593_p13 = scmp.eq.s32.totalorder %s590_s24, 0 }
 0x1b7   : > { %s1094_s20 = sshrl.u32 (!%p593_p13), %s1141_s23, 1 }
 0x1b8   : > { %326 = sbr.rel (%p593_p13) target bundleno = 485 (0x1e5), region = 44  ;;  %p594_p1 = scmp.le.s32.totalorder (!%p593_p13), %s1094_s20, 0 }
 0x1bf   : > { %506 = sbr.rel (%p594_p1) target bundleno = 464 (0x1d0), region = 135  ;;  %s860_s13 = smov (!%p594_p1), %s1088_s22  }
 0x1c0   : > { %s864_s26 = smov (!%p594_p1), %s1076_s5   ;;  %s868_s28 = smov (!%p594_p1), 0  }
 0x1c1   : > { %s872_s29 = smov (!%p594_p1), 0  }
 0x1c6 LB: >> { %v390_v0 = vld [vmem:[%s866_s26] sm:$0xff]  ;;  %v392_v1 = vld [vmem:[%s866_s26 + $0x8] sm:$0xff]  ;;  %s394_s30 = sadd.s32 1, %s870_s28  ;;  %s384_s29 = sadd.s32 1, %s874_s29   ;;  %s874_s29 = sphi %s872_s29, %s384_s29   ;;  %s870_s28 = sphi %s868_s28, %s869_s28   ;;  %s866_s26 = sphi %s864_s26, %s399_s26   ;;  %s862_s13 = sphi %s860_s13, %s400_s13  }
 0x1c7   : >> { %391 = vst [vmem:[%s862_s13] sm:$0xff] %v390_v0  ;;  %393 = vst [vmem:[%s862_s13 + $0x8] sm:$0xff] %v392_v1  ;;  %p395_p2 = scmp.ge.s32.totalorder %s394_s30, %s1094_s20  ;;  %p383_p3 = scmp.ge.s32.totalorder %s384_s29, %s1094_s20 }
 0x1c9   : >> { %s1143_s30 = smov (%p395_p2, %s394_s30), 0  ;;  %386 = sbr.rel (!%p383_p3) target bundleno = 454 (0x1c6), region = 141 }
 0x1ca   : >> { %s595_s3 = sshll.u32 %s1143_s30, 4  ;;  %s869_s28 = smov %s1143_s30  }
 0x1cb   : >> { %s399_s26 = scalar_lea.vmem %s1076_s5, %s595_s3 [#allocation6]   ;;  %s400_s13 = scalar_lea.vmem %s1088_s22, %s595_s3  }
 0x1d0 PF: > { %s1104_s6 = sand.u32 1, %s1141_s23   ;;  %s612_s8 = sshll.u32 %s1094_s20, 4 }
 0x1d1   : > { %s405_s25 = scalar_lea.vmem %s1076_s5, %s612_s8 [#allocation6]   ;;  %s407_s18 = scalar_lea.vmem %s1088_s22, %s612_s8  }
 0x1d2   : > { %p600_p8 = scmp.le.s32.totalorder %s1104_s6, 0 }
 0x1d3   : > { %s876_s27 = smov (!%p600_p8), %s407_s18   ;;  %s880_s4 = smov (!%p600_p8), %s405_s25  }
 0x1d4   : > { %520 = sbr.rel (%p600_p8) target bundleno = 485 (0x1e5), region = 146  ;;  %s884_s7 = smov (!%p600_p8), 0  }
 0x1d5   : > { %s888_s12 = smov (!%p600_p8), 0  }
 0x1db LB: >> { %v417_v2 = vld [vmem:[%s882_s4] sm:$0xff]  ;;  %s419_s19 = sadd.s32 1, %s886_s7  ;;  %s411_s12 = sadd.s32 1, %s890_s12   ;;  %s890_s12 = sphi %s888_s12, %s411_s12   ;;  %s886_s7 = sphi %s884_s7, %s885_s7   ;;  %s882_s4 = sphi %s880_s4, %s424_s4   ;;  %s878_s27 = sphi %s876_s27, %s425_s27  }
 0x1dc   : >> { %418 = vst [vmem:[%s878_s27] sm:$0xff] %v417_v2  ;;  %p420_p11 = scmp.ge.s32.totalorder %s419_s19, %s1104_s6  ;;  %p410_p0 = scmp.ge.s32.totalorder %s411_s12, %s1104_s6 }
 0x1de   : >> { %s1145_s19 = smov (%p420_p11, %s419_s19), 0  ;;  %413 = sbr.rel (!%p410_p0) target bundleno = 475 (0x1db), region = 152 }
 0x1df   : >> { %s601_s9 = sshll.u32 %s1145_s19, 3  ;;  %s885_s7 = smov %s1145_s19  }
 0x1e0   : >> { %s424_s4 = scalar_lea.vmem %s405_s25, %s601_s9 [#allocation6]   ;;  %s425_s27 = scalar_lea.vmem %s407_s18, %s601_s9  }
 0x1e5 PF: > { %p15_p6 = scmp.ge.s32.totalorder %s935_s14, 4   ;;  %s1132_s9 = smov %s850_s10 }
 0x1e6   : > { %s1133_s10 = smov %s854_s11  ;;  %s1134_s11 = smov %s945_s17 }
 0x1e7   : > { %s1135_s12 = smov %s935_s14  ;;  %17 = sbr.rel (!%p15_p6) target bundleno = 5 (0x5), region = 163 }
 0x1ee   :  { %441 = vsyncpa [#allocation3], 1 }
 0x1ef   :  { %443 = vsyncpa [#allocation3 + $0x1], 1 }
 0x1f0   :  { %444 = vsyncpa [#allocation5], 1 }
 0x1f1   :  { %446 = vsyncpa [#allocation5 + $0x1], 1 }

</bundles_post_ra>
